<compile_context>
chip_gen: v5e
topology: v5e:2x2
jax: 0.10.0
libtpu: 0.0.40
codegen_flags: <defaults>
</compile_context>

<pallas_src>
import jax
import jax.numpy as jnp
from jax import lax
from jax.experimental import pallas as pl
from jax.experimental.pallas import tpu as pltpu

EPS = 1e-5  # SynchronizedBatchNorm3d default


def _round_up(x, m):
    return (x + m - 1) // m * m


# ---------------- Pallas kernels ----------------

def _conv_stats_kernel(p_ref, w_ref, o_ref, psum_ref, psq_ref):
    """One K-packed MXU matmul per (batch, M-tile) + fused BN partial sums.

    p_ref: (1, TM, Kp) bf16 im2col patch tile; w_ref: (Kp, Cp) bf16 tap matrix.
    """
    # vreg-resident f32 accumulator; single store to o_ref per tile.
    acc = jnp.dot(p_ref[0], w_ref[...], preferred_element_type=jnp.float32)  # (TM, Cp)
    o_ref[0] = acc
    # BN batch-statistics partials from the still-hot accumulator.
    # Zero-padded rows/columns contribute exactly 0, so no mask is needed.
    psum_ref[0] = jnp.sum(acc, axis=0, keepdims=True)
    psq_ref[0] = jnp.sum(acc * acc, axis=0, keepdims=True)


def _bn_relu_kernel(x_ref, scale_ref, shift_ref, o_ref):
    # y = x * scale + shift, then ReLU (scale/shift precomputed from batch stats).
    o_ref[0] = jnp.maximum(x_ref[0] * scale_ref[...] + shift_ref[...], 0.0)


# ---------------- wrapper ----------------

@jax.jit
def conv_down_forward(x_ncdhw, weight, bias, gamma, beta):
    """x_ncdhw: (N, Cin, D, H, W); weight: (Cout, Cin, 3, 3, 3). Returns NCDHW."""
    del bias  # exactly cancelled by train-mode BN (mean absorbs it) -- per perf feedback

    N, Cin, D, H, W = x_ncdhw.shape
    Cout = weight.shape[0]
    # PyTorch output sizing for k=3, s=2, p=1 (works for odd dims too).
    Do = (D - 1) // 2 + 1
    Ho = (H - 1) // 2 + 1
    Wo = (W - 1) // 2 + 1
    M = Do * Ho * Wo                       # valid output voxels per batch item
    Kc = 27 * Cin                          # packed matmul K (taps folded onto lanes)
    Kp = _round_up(Kc, 128)                # lane-dense K
    Cp = _round_up(Cout, 128)              # lane-dense output channels

    TM = 512 if M > 512 else _round_up(M, 8)   # rows per grid step (sublane aligned)
    Mt = _round_up(M, TM)
    num_m = Mt // TM

    # ---- XLA glue: channels-last bf16, spatial pad, per-voxel 27-tap im2col ----
    x = jnp.transpose(x_ncdhw, (0, 2, 3, 4, 1)).astype(jnp.bfloat16)   # bf16 BEFORE the call
    x_pad = jnp.pad(x, ((0, 0), (1, 1), (1, 1), (1, 1), (0, 0)))
    taps = []
    for kd in range(3):
        for kh in range(3):
            for kw in range(3):
                taps.append(x_pad[:, kd:kd + 2 * Do - 1:2,
                                  kh:kh + 2 * Ho - 1:2,
                                  kw:kw + 2 * Wo - 1:2, :])
    patches = jnp.concatenate(taps, axis=-1).reshape(N, M, Kc)          # (N, M, 27*Cin) bf16
    patches = jnp.pad(patches, ((0, 0), (0, Mt - M), (0, Kp - Kc)))     # zero rows/cols

    # weights -> (Kp, Cp) bf16 tap matrix matching the (kd, kh, kw, cin) K-order
    w = jnp.transpose(weight, (2, 3, 4, 1, 0)).reshape(Kc, Cout)
    w = jnp.pad(w, ((0, Kp - Kc), (0, Cp - Cout))).astype(jnp.bfloat16)

    gamma_p = jnp.pad(gamma.astype(jnp.float32), (0, Cp - Cout))
    beta_p = jnp.pad(beta.astype(jnp.float32), (0, Cp - Cout))

    # ---- kernel 1: K-packed conv matmul + fused BN partial stats ----
    conv_out, psum, psq = pl.pallas_call(
        _conv_stats_kernel,
        out_shape=(
            jax.ShapeDtypeStruct((N, Mt, Cp), jnp.float32),
            jax.ShapeDtypeStruct((N, num_m, Cp), jnp.float32),
            jax.ShapeDtypeStruct((N, num_m, Cp), jnp.float32),
        ),
        grid_spec=pltpu.PrefetchScalarGridSpec(
            num_scalar_prefetch=0,
            grid=(N, num_m),
            in_specs=[
                pl.BlockSpec((1, TM, Kp), lambda n, m: (n, m, 0)),   # bf16 patch tile
                pl.BlockSpec((Kp, Cp), lambda n, m: (0, 0)),         # bf16 tap weights
            ],
            out_specs=(
                pl.BlockSpec((1, TM, Cp), lambda n, m: (n, m, 0)),   # conv (f32)
                pl.BlockSpec((1, 1, Cp), lambda n, m: (n, m, 0)),    # partial sum
                pl.BlockSpec((1, 1, Cp), lambda n, m: (n, m, 0)),    # partial sum of squares
            ),
        ),
        compiler_params=pltpu.CompilerParams(
            dimension_semantics=("parallel", "parallel"),  # batch & M-tiles shard across TCs
        ),
    )(patches, w)

    # ---- finish BN stats (tiny (Cp,) math), precompute scale/shift rows ----
    # TODO(synk): single-pass E[x^2]-E[x]^2 in f32; fine here, switch to Welford-style
    #             partial merging if activations develop a large mean.
    mtot = jnp.float32(N * M)
    mean = jnp.sum(psum, axis=(0, 1)) / mtot
    var = jnp.maximum(jnp.sum(psq, axis=(0, 1)) / mtot - mean * mean, 0.0)
    inv = lax.rsqrt(var + EPS)
    scale = (gamma_p * inv).reshape(1, Cp)
    shift = (beta_p - mean * gamma_p * inv).reshape(1, Cp)

    # ---- kernel 2: BN affine + ReLU, in-place on conv_out (aliased) ----
    y_flat = pl.pallas_call(
        _bn_relu_kernel,
        out_shape=jax.ShapeDtypeStruct((N, Mt, Cp), jnp.float32),
        grid_spec=pltpu.PrefetchScalarGridSpec(
            num_scalar_prefetch=0,
            grid=(N, num_m),
            in_specs=[
                pl.BlockSpec((1, TM, Cp), lambda n, m: (n, m, 0)),
                pl.BlockSpec((1, Cp), lambda n, m: (0, 0)),
                pl.BlockSpec((1, Cp), lambda n, m: (0, 0)),
            ],
            out_specs=pl.BlockSpec((1, TM, Cp), lambda n, m: (n, m, 0)),
        ),
        input_output_aliases={0: 0},
        compiler_params=pltpu.CompilerParams(
            dimension_semantics=("parallel", "parallel"),
        ),
    )(conv_out, scale, shift)

    # drop M/channel padding, back to NCDHW like PyTorch
    y = y_flat[:, :M, :Cout].reshape(N, Do, Ho, Wo, Cout)
    return jnp.transpose(y, (0, 4, 1, 2, 3))


# ---------------- pure-JAX reference (bf16 conv operands, like the kernel) ----------------

def conv_down_ref(x, weight, bias, gamma, beta):
    conv = lax.conv_general_dilated(
        x.astype(jnp.bfloat16), weight.astype(jnp.bfloat16),
        window_strides=(2, 2, 2),
        padding=((1, 1), (1, 1), (1, 1)),
        dimension_numbers=("NCDHW", "OIDHW", "NCDHW"),
        preferred_element_type=jnp.float32,
    ) + bias.reshape(1, -1, 1, 1, 1)
    mean = conv.mean(axis=(0, 2, 3, 4), keepdims=True)
    var = conv.var(axis=(0, 2, 3, 4), keepdims=True)  # biased, like BN train mode
    y = (conv - mean) * lax.rsqrt(var + EPS) * gamma.reshape(1, -1, 1, 1, 1) \
        + beta.reshape(1, -1, 1, 1, 1)
    return jnp.maximum(y, 0.0)


if __name__ == "__main__":
    key = jax.random.PRNGKey(0)
    N, Cin, D, H, W = 2, 4, 16, 16, 16
    Cout = 8

    k1, k2, k3, k4, k5 = jax.random.split(key, 5)
    x = jax.random.normal(k1, (N, Cin, D, H, W), dtype=jnp.float32)
    weight = jax.random.normal(k2, (Cout, Cin, 3, 3, 3), dtype=jnp.float32) * 0.1
    bias = jax.random.normal(k3, (Cout,), dtype=jnp.float32) * 0.1
    gamma = 1.0 + 0.1 * jax.random.normal(k4, (Cout,), dtype=jnp.float32)
    beta = 0.1 * jax.random.normal(k5, (Cout,), dtype=jnp.float32)

    out = conv_down_forward(x, weight, bias, gamma, beta)
    out = jax.block_until_ready(out)

    ref = conv_down_ref(x, weight, bias, gamma, beta)
    assert out.shape == ref.shape, (out.shape, ref.shape)
    assert bool(jnp.allclose(out, ref, atol=1e-3, rtol=1e-3)), "mismatch vs reference"

    print("KERNEL_OK")
</pallas_src>

<mosaic_0001>
module attributes {stable_mosaic.version = 11 : i64} {
  func.func @_conv_stats_kernel(%arg0: i32, %arg1: i32, %arg2: memref<1x512x128xbf16, #tpu.memory_space<vmem>>, %arg3: memref<128x128xbf16, #tpu.memory_space<vmem>>, %arg4: memref<1x512x128xf32, #tpu.memory_space<vmem>>, %arg5: memref<1x1x128xf32, #tpu.memory_space<vmem>>, %arg6: memref<1x1x128xf32, #tpu.memory_space<vmem>>) attributes {dimension_semantics = [#tpu.dimension_semantics<parallel>, #tpu.dimension_semantics<parallel>], iteration_bounds = array<i64: 2, 1>, scalar_prefetch = 0 : i64, scratch_operands = 0 : i64, tpu.core_type = #tpu.core_type<tc>, window_params = [{transform_indices = @transform_0, window_bounds = array<i64: 1, 512, 128>}, {pipeline_mode = #tpu.pipeline_mode<synchronous>, transform_indices = @transform_1, window_bounds = array<i64: 128, 128>}, {transform_indices = @transform_2, window_bounds = array<i64: 1, 512, 128>}, {transform_indices = @transform_3, window_bounds = array<i64: 1, 1, 128>}, {transform_indices = @transform_4, window_bounds = array<i64: 1, 1, 128>}]} {
    %c0 = arith.constant 0 : index
    %c0_0 = arith.constant 0 : index
    %c0_1 = arith.constant 0 : index
    %0 = vector.load %arg2[%c0, %c0_0, %c0_1] : memref<1x512x128xbf16, #tpu.memory_space<vmem>>, vector<1x512x128xbf16>
    %1 = vector.shape_cast %0 : vector<1x512x128xbf16> to vector<512x128xbf16>
    %c0_2 = arith.constant 0 : index
    %c0_3 = arith.constant 0 : index
    %2 = vector.load %arg3[%c0_2, %c0_3] : memref<128x128xbf16, #tpu.memory_space<vmem>>, vector<128x128xbf16>
    %cst = arith.constant dense<0.000000e+00> : vector<512x128xf32>
    %3 = tpu.matmul %1, %2, %cst {dimension_numbers = #tpu.dot_dimension_numbers<[1], [0], [0], [1], [0, 0, 1, 1], [], []>} : vector<512x128xbf16>, vector<128x128xbf16>, vector<512x128xf32> -> vector<512x128xf32>
    %c0_4 = arith.constant 0 : index
    %c0_5 = arith.constant 0 : index
    %c0_6 = arith.constant 0 : index
    %4 = vector.load %arg4[%c0_4, %c0_5, %c0_6] : memref<1x512x128xf32, #tpu.memory_space<vmem>>, vector<1x512x128xf32>
    %5 = vector.shape_cast %4 : vector<1x512x128xf32> to vector<512x128xf32>
    %6 = vector.shape_cast %3 : vector<512x128xf32> to vector<1x512x128xf32>
    tpu.vector_store %arg4[%c0_4, %c0_5, %c0_6], %6 {strides = array<i32>} : memref<1x512x128xf32, #tpu.memory_space<vmem>>, vector<1x512x128xf32>,
    %cst_7 = arith.constant dense<0.000000e+00> : vector<128xf32>
    %7 = vector.multi_reduction <add>, %3, %cst_7 [0] : vector<512x128xf32> to vector<128xf32>
    %8 = vector.shape_cast %7 : vector<128xf32> to vector<1x128xf32>
    %c0_8 = arith.constant 0 : index
    %c0_9 = arith.constant 0 : index
    %c0_10 = arith.constant 0 : index
    %9 = vector.load %arg5[%c0_8, %c0_9, %c0_10] : memref<1x1x128xf32, #tpu.memory_space<vmem>>, vector<1x1x128xf32>
    %10 = vector.shape_cast %9 : vector<1x1x128xf32> to vector<1x128xf32>
    %11 = vector.shape_cast %8 : vector<1x128xf32> to vector<1x1x128xf32>
    tpu.vector_store %arg5[%c0_8, %c0_9, %c0_10], %11 {strides = array<i32>} : memref<1x1x128xf32, #tpu.memory_space<vmem>>, vector<1x1x128xf32>,
    %12 = arith.mulf %3, %3 : vector<512x128xf32>
    %cst_11 = arith.constant dense<0.000000e+00> : vector<128xf32>
    %13 = vector.multi_reduction <add>, %12, %cst_11 [0] : vector<512x128xf32> to vector<128xf32>
    %14 = vector.shape_cast %13 : vector<128xf32> to vector<1x128xf32>
    %c0_12 = arith.constant 0 : index
    %c0_13 = arith.constant 0 : index
    %c0_14 = arith.constant 0 : index
    %15 = vector.load %arg6[%c0_12, %c0_13, %c0_14] : memref<1x1x128xf32, #tpu.memory_space<vmem>>, vector<1x1x128xf32>
    %16 = vector.shape_cast %15 : vector<1x1x128xf32> to vector<1x128xf32>
    %17 = vector.shape_cast %14 : vector<1x128xf32> to vector<1x1x128xf32>
    tpu.vector_store %arg6[%c0_12, %c0_13, %c0_14], %17 {strides = array<i32>} : memref<1x1x128xf32, #tpu.memory_space<vmem>>, vector<1x1x128xf32>,
    return
  }
  func.func @transform_0(%arg0: i32, %arg1: i32) -> (i32, i32, i32) {
    %c0_i32 = arith.constant 0 : i32
    %c0_i32_0 = arith.constant 0 : i32
    return %arg0, %arg1, %c0_i32 : i32, i32, i32
  }
  func.func @transform_1(%arg0: i32, %arg1: i32) -> (i32, i32) {
    %c0_i32 = arith.constant 0 : i32
    %c0_i32_0 = arith.constant 0 : i32
    %c0_i32_1 = arith.constant 0 : i32
    return %c0_i32, %c0_i32_0 : i32, i32
  }
  func.func @transform_2(%arg0: i32, %arg1: i32) -> (i32, i32, i32) {
    %c0_i32 = arith.constant 0 : i32
    %c0_i32_0 = arith.constant 0 : i32
    return %arg0, %arg1, %c0_i32 : i32, i32, i32
  }
  func.func @transform_3(%arg0: i32, %arg1: i32) -> (i32, i32, i32) {
    %c0_i32 = arith.constant 0 : i32
    %c0_i32_0 = arith.constant 0 : i32
    return %arg0, %arg1, %c0_i32 : i32, i32, i32
  }
  func.func @transform_4(%arg0: i32, %arg1: i32) -> (i32, i32, i32) {
    %c0_i32 = arith.constant 0 : i32
    %c0_i32_0 = arith.constant 0 : i32
    return %arg0, %arg1, %c0_i32 : i32, i32, i32
  }
}

module attributes {stable_mosaic.version = 11 : i64} {
  func.func @_bn_relu_kernel(%arg0: i32, %arg1: i32, %arg2: memref<1x512x128xf32, #tpu.memory_space<vmem>>, %arg3: memref<1x128xf32, #tpu.memory_space<vmem>>, %arg4: memref<1x128xf32, #tpu.memory_space<vmem>>, %arg5: memref<1x512x128xf32, #tpu.memory_space<vmem>>) attributes {dimension_semantics = [#tpu.dimension_semantics<parallel>, #tpu.dimension_semantics<parallel>], iteration_bounds = array<i64: 2, 1>, scalar_prefetch = 0 : i64, scratch_operands = 0 : i64, tpu.core_type = #tpu.core_type<tc>, window_params = [{transform_indices = @transform_0, window_bounds = array<i64: 1, 512, 128>}, {pipeline_mode = #tpu.pipeline_mode<synchronous>, transform_indices = @transform_1, window_bounds = array<i64: 1, 128>}, {pipeline_mode = #tpu.pipeline_mode<synchronous>, transform_indices = @transform_2, window_bounds = array<i64: 1, 128>}, {transform_indices = @transform_3, window_bounds = array<i64: 1, 512, 128>}]} {
    %c0 = arith.constant 0 : index
    %c0_0 = arith.constant 0 : index
    %c0_1 = arith.constant 0 : index
    %0 = vector.load %arg2[%c0, %c0_0, %c0_1] : memref<1x512x128xf32, #tpu.memory_space<vmem>>, vector<1x512x128xf32>
    %1 = vector.shape_cast %0 : vector<1x512x128xf32> to vector<512x128xf32>
    %c0_2 = arith.constant 0 : index
    %c0_3 = arith.constant 0 : index
    %2 = vector.load %arg3[%c0_2, %c0_3] : memref<1x128xf32, #tpu.memory_space<vmem>>, vector<1x128xf32>
    %3 = vector.broadcast %2 : vector<1x128xf32> to vector<512x128xf32>
    %4 = arith.mulf %1, %3 : vector<512x128xf32>
    %c0_4 = arith.constant 0 : index
    %c0_5 = arith.constant 0 : index
    %5 = vector.load %arg4[%c0_4, %c0_5] : memref<1x128xf32, #tpu.memory_space<vmem>>, vector<1x128xf32>
    %6 = vector.broadcast %5 : vector<1x128xf32> to vector<512x128xf32>
    %7 = arith.addf %4, %6 : vector<512x128xf32>
    %cst = arith.constant 0.000000e+00 : f32
    %8 = vector.broadcast %cst : f32 to vector<512x128xf32>
    %9 = arith.maximumf %7, %8 : vector<512x128xf32>
    %c0_6 = arith.constant 0 : index
    %c0_7 = arith.constant 0 : index
    %c0_8 = arith.constant 0 : index
    %10 = vector.load %arg5[%c0_6, %c0_7, %c0_8] : memref<1x512x128xf32, #tpu.memory_space<vmem>>, vector<1x512x128xf32>
    %11 = vector.shape_cast %10 : vector<1x512x128xf32> to vector<512x128xf32>
    %12 = vector.shape_cast %9 : vector<512x128xf32> to vector<1x512x128xf32>
    tpu.vector_store %arg5[%c0_6, %c0_7, %c0_8], %12 {strides = array<i32>} : memref<1x512x128xf32, #tpu.memory_space<vmem>>, vector<1x512x128xf32>,
    return
  }
  func.func @transform_0(%arg0: i32, %arg1: i32) -> (i32, i32, i32) {
    %c0_i32 = arith.constant 0 : i32
    %c0_i32_0 = arith.constant 0 : i32
    return %arg0, %arg1, %c0_i32 : i32, i32, i32
  }
  func.func @transform_1(%arg0: i32, %arg1: i32) -> (i32, i32) {
    %c0_i32 = arith.constant 0 : i32
    %c0_i32_0 = arith.constant 0 : i32
    %c0_i32_1 = arith.constant 0 : i32
    return %c0_i32, %c0_i32_0 : i32, i32
  }
  func.func @transform_2(%arg0: i32, %arg1: i32) -> (i32, i32) {
    %c0_i32 = arith.constant 0 : i32
    %c0_i32_0 = arith.constant 0 : i32
    %c0_i32_1 = arith.constant 0 : i32
    return %c0_i32, %c0_i32_0 : i32, i32
  }
  func.func @transform_3(%arg0: i32, %arg1: i32) -> (i32, i32, i32) {
    %c0_i32 = arith.constant 0 : i32
    %c0_i32_0 = arith.constant 0 : i32
    return %arg0, %arg1, %c0_i32 : i32, i32, i32
  }
}

</mosaic_0001>

<bundles_post_ra>
// kernel: conv_down_forward.3
= control target key start
LH: loop header
LB: loop body
LE: loop exit
PB: predicated region body
PF: predicated region fallthrough
CT: control target
= control target key end

     0   :  { %s708_s12 = smov 0   ;;  %s710_s13 = smov 0   ;;  %s1203_s0 = inlined_call_operand.vmem [shape: f32[2,512,128], index: 0, kind: input, shape index: {}, may-alias: {0,3}]   ;;  %s1204_s1 = inlined_call_operand.vmem [shape: f32[1,128], index: 1, kind: input, shape index: {}]   ;;  %s1205_s2 = inlined_call_operand.vmem [shape: f32[1,128], index: 2, kind: input, shape index: {}]   ;;  %s1206_s3 = inlined_call_operand.vmem [shape: f32[2,512,128], index: 3, kind: output, shape index: {}, may-alias: {0,3}]  }
   0x1   :  { %s712_s14 = smov 0  }
   0x2 LB: > { %s25_s15 = sadd.s32 1, %s682_s13  ;;  %p629_p0 = scmp.ge.s32.totalorder %s686_s14, 1  ;;  %s686_s14 = sphi %s712_s14, %s13_s14   ;;  %s682_s13 = sphi %s710_s13, %s1227_s13   ;;  %s678_s12 = sphi %s708_s12, %s1226_s12  }
   0x3   : > { %p27_p1 = scmp.ge.s32.totalorder %s25_s15, 2  ;;  %p158_p2 = scmp.lt.s32.totalorder %s686_s14, 3 }
   0x5   : > { %s1229_s15 = smov (%p27_p1, %s25_s15), 0  ;;  %p159_p3 = pnand %p629_p0, %p158_p2 }
   0x7   : > { %162 = sbr.rel (%p159_p3) target bundleno = 108 (0x6c), region = 32 }
   0xc   : > { %p191_p4 = scmp.lt.s32.totalorder %s678_s12, 1  ;;  %v739_v0 = vld [vmem:[%s1204_s1] ss:$0 sm:$0xff] }
   0xd   : > { %v749_v6 = vld [vmem:[%s1205_s2] ss:$0 sm:$0xff] }
   0xe   : > { %s1231_s12 = smov (!%p191_p4, %s678_s12), 1 }
   0xf   : > { %s636_s16 = sshll.u32 %s1231_s12, 9 }
  0x10   : > { %s734_s19 = scalar_lea.vmem %s1203_s0, %s636_s16  ;;  %s800_s26 = scalar_lea.vmem %s1206_s3, %s636_s16 }
  0x11   : > { %v210_v1 = vld [vmem:[%s734_s19] sm:$0xff]  ;;  %v211_v2 = vld [vmem:[%s734_s19 + $0x8] sm:$0xff]  ;;  %v212_v3 = vld [vmem:[%s734_s19 + $0x10] sm:$0xff] }
  0x12   : > { %v213_v4 = vld [vmem:[%s734_s19 + $0x18] sm:$0xff]  ;;  %v278_v5 = vmul.f32 %v739_v0, %v210_v1  ;;  %v214_v7 = vld [vmem:[%s734_s19 + $0x20] sm:$0xff]  ;;  %v279_v8 = vmul.f32 %v739_v0, %v211_v2  ;;  %v215_v9 = vld [vmem:[%s734_s19 + $0x28] sm:$0xff]  ;;  %v280_v10 = vmul.f32 %v739_v0, %v212_v3 }
  0x13   : > { %v216_v11 = vld [vmem:[%s734_s19 + $0x30] sm:$0xff]  ;;  %v281_v12 = vmul.f32 %v739_v0, %v213_v4  ;;  %v217_v13 = vld [vmem:[%s734_s19 + $0x38] sm:$0xff]  ;;  %v282_v15 = vmul.f32 %v739_v0, %v214_v7  ;;  %v218_v16 = vld [vmem:[%s734_s19 + $0x40] sm:$0xff]  ;;  %v283_v18 = vmul.f32 %v739_v0, %v215_v9 }
  0x14   : > { %v759_v14 = vadd.f32 %v749_v6, %v278_v5  ;;  %v764_v17 = vadd.f32 %v749_v6, %v279_v8  ;;  %v219_v19 = vld [vmem:[%s734_s19 + $0x48] sm:$0xff]  ;;  %v769_v20 = vadd.f32 %v749_v6, %v280_v10  ;;  %v284_v21 = vmul.f32 %v739_v0, %v216_v11  ;;  %v220_v22 = vld [vmem:[%s734_s19 + $0x50] sm:$0xff]  ;;  %v780_v25 = vld [vmem:[%s734_s19 + $0x58] sm:$0xff] }
  0x15   : > { %v774_v23 = vadd.f32 %v749_v6, %v281_v12  ;;  %v777_v24 = vmul.f32 %v739_v0, %v217_v13  ;;  %v783_v26 = vld [vmem:[%s734_s19 + $0x60] sm:$0xff]  ;;  %v786_v27 = vld [vmem:[%s734_s19 + $0x68] sm:$0xff]  ;;  %v790_v29 = vadd.f32 %v749_v6, %v282_v15  ;;  %v793_v30 = vmul.f32 %v739_v0, %v218_v16  ;;  %v803_v31 = vld [vmem:[%s734_s19 + $0x70] sm:$0xff] }
  0x16   : > { %v806_v32 = vld [vmem:[%s734_s19 + $0x78] sm:$0xff]  ;;  %v809_v33 = vld [vmem:[%s734_s19 + $0x80] sm:$0xff]  ;;  %v812_v34 = vld [vmem:[%s734_s19 + $0x88] sm:$0xff]  ;;  %v411_v13 = vmax.f32 %v764_v17, 0.0  ;;  %v351_v15 = vadd.f32 %v749_v6, %v283_v18  ;;  %v287_v16 = vmul.f32 %v739_v0, %v219_v19 }
  0x17   : > { %v815_v35 = vld [vmem:[%s734_s19 + $0x90] sm:$0xff]  ;;  %v818_v36 = vld [vmem:[%s734_s19 + $0x98] sm:$0xff]  ;;  %v821_v37 = vld [vmem:[%s734_s19 + $0xa0] sm:$0xff]  ;;  %v413_v19 = vmax.f32 %v774_v23, 0.0 }
  0x18   : > { %v824_v38 = vld [vmem:[%s734_s19 + $0xa8] sm:$0xff]  ;;  %v827_v39 = vld [vmem:[%s734_s19 + $0xb0] sm:$0xff]  ;;  %v830_v40 = vld [vmem:[%s734_s19 + $0xb8] sm:$0xff]  ;;  %v415_v23 = vmax.f32 %v351_v15, 0.0 }
  0x19   : > { %v833_v41 = vld [vmem:[%s734_s19 + $0xc0] sm:$0xff]  ;;  %v836_v42 = vld [vmem:[%s734_s19 + $0xc8] sm:$0xff]  ;;  %v839_v43 = vld [vmem:[%s734_s19 + $0xd0] sm:$0xff] }
  0x1a   : > { %v842_v44 = vld [vmem:[%s734_s19 + $0xd8] sm:$0xff]  ;;  %v845_v45 = vld [vmem:[%s734_s19 + $0xe0] sm:$0xff]  ;;  %v848_v46 = vld [vmem:[%s734_s19 + $0xe8] sm:$0xff] }
  0x1b   : > { %v851_v47 = vld [vmem:[%s734_s19 + $0xf0] sm:$0xff]  ;;  %v854_v48 = vld [vmem:[%s734_s19 + $0xf8] sm:$0xff]  ;;  %v857_v49 = vld [vmem:[%s734_s19 + $0x100] sm:$0xff] }
  0x1c   : > { %v860_v50 = vld [vmem:[%s734_s19 + $0x108] sm:$0xff]  ;;  %v863_v51 = vld [vmem:[%s734_s19 + $0x110] sm:$0xff]  ;;  %v866_v52 = vld [vmem:[%s734_s19 + $0x118] sm:$0xff] }
  0x1d   : > { %v869_v53 = vld [vmem:[%s734_s19 + $0x120] sm:$0xff]  ;;  %v872_v54 = vld [vmem:[%s734_s19 + $0x128] sm:$0xff]  ;;  %v875_v55 = vld [vmem:[%s734_s19 + $0x130] sm:$0xff] }
  0x1e   : > { %v878_v56 = vld [vmem:[%s734_s19 + $0x138] sm:$0xff]  ;;  %v881_v57 = vld [vmem:[%s734_s19 + $0x140] sm:$0xff]  ;;  %v884_v58 = vld [vmem:[%s734_s19 + $0x148] sm:$0xff] }
  0x1f   : > { %v887_v59 = vld [vmem:[%s734_s19 + $0x150] sm:$0xff]  ;;  %v890_v60 = vld [vmem:[%s734_s19 + $0x158] sm:$0xff]  ;;  %v893_v61 = vld [vmem:[%s734_s19 + $0x160] sm:$0xff] }
  0x20   : > { %v896_v62 = vld [vmem:[%s734_s19 + $0x168] sm:$0xff]  ;;  %v899_v63 = vld [vmem:[%s734_s19 + $0x170] sm:$0xff]  ;;  %v902_v1 = vld [vmem:[%s734_s19 + $0x178] sm:$0xff] }
  0x21   : > { %v905_v2 = vld [vmem:[%s734_s19 + $0x180] sm:$0xff]  ;;  %v908_v3 = vld [vmem:[%s734_s19 + $0x188] sm:$0xff]  ;;  %v911_v4 = vld [vmem:[%s734_s19 + $0x190] sm:$0xff] }
  0x22   : > { %v914_v5 = vld [vmem:[%s734_s19 + $0x198] sm:$0xff]  ;;  %v917_v7 = vld [vmem:[%s734_s19 + $0x1a0] sm:$0xff]  ;;  %v920_v8 = vld [vmem:[%s734_s19 + $0x1a8] sm:$0xff] }
  0x23   : > { %1207 = vst [vmem:[#allocation2_spill] sm:$0xff] %v917_v7  ;;  %v923_v9 = vld [vmem:[%s734_s19 + $0x1b0] sm:$0xff]  ;;  %v926_v10 = vld [vmem:[%s734_s19 + $0x1b8] sm:$0xff]  ;;  %v929_v11 = vld [vmem:[%s734_s19 + $0x1c0] sm:$0xff] }
  0x24   : > { %1208 = vst [vmem:[#allocation3_spill] sm:$0xff] %v920_v8  ;;  %v932_v12 = vld [vmem:[%s734_s19 + $0x1c8] sm:$0xff]  ;;  %v938_v28 = vld [vmem:[%s734_s19 + $0x1d0] sm:$0xff]  ;;  %v941_v8 = vld [vmem:[%s734_s19 + $0x1d8] sm:$0xff] }
  0x25   : > { %1209 = vst [vmem:[#allocation4_spill] sm:$0xff] %v923_v9  ;;  %v944_v7 = vld [vmem:[%s734_s19 + $0x1e0] sm:$0xff]  ;;  %v950_v9 = vld [vmem:[%s734_s19 + $0x1e8] sm:$0xff]  ;;  %v953_v17 = vld [vmem:[%s734_s19 + $0x1f0] sm:$0xff] }
  0x26   : > { %1210 = vst [vmem:[#allocation5_spill] sm:$0xff] %v926_v10  ;;  %v412_v10 = vmax.f32 %v769_v20, 0.0  ;;  %v956_v18 = vld [vmem:[%s734_s19 + $0x1f8] sm:$0xff]  ;;  %v289_v20 = vmul.f32 %v739_v0, %v780_v25  ;;  %v291_v25 = vmul.f32 %v739_v0, %v786_v27 }
  0x27   : > { %1211 = vst [vmem:[#allocation6_spill] sm:$0xff] %v929_v11  ;;  %v352_v11 = vadd.f32 %v749_v6, %v284_v21  ;;  %v1216_v21 = vmax.f32 %v759_v14, 0.0 }
  0x28   : > { %1212 = vst [vmem:[#allocation7_spill] sm:$0xff] %v932_v12  ;;  %v288_v12 = vmul.f32 %v739_v0, %v220_v22  ;;  %v414_v22 = vmax.f32 %v790_v29, 0.0  ;;  %v292_v29 = vmul.f32 %v739_v0, %v803_v31  ;;  %v359_v31 = vadd.f32 %v749_v6, %v291_v25 }
  0x29   : > { %1213 = vst [vmem:[#allocation8_spill] sm:$0xff] %v941_v8  ;;  %v353_v8 = vadd.f32 %v749_v6, %v777_v24  ;;  %v355_v24 = vadd.f32 %v749_v6, %v287_v16  ;;  %v416_v14 = vmax.f32 %v352_v11, 0.0  ;;  %v296_v16 = vmul.f32 %v739_v0, %v815_v35 }
  0x2a   : > { %1214 = vst [vmem:[#allocation9_spill] sm:$0xff] %v950_v9  ;;  %v290_v9 = vmul.f32 %v739_v0, %v783_v26  ;;  %v357_v26 = vadd.f32 %v749_v6, %v289_v20  ;;  %v298_v20 = vmul.f32 %v739_v0, %v821_v37  ;;  %v300_v25 = vmul.f32 %v739_v0, %v827_v39 }
  0x2b   : > { %1215 = vst [vmem:[#allocation10_spill] sm:$0xff] %v953_v17  ;;  %v354_v17 = vadd.f32 %v749_v6, %v793_v30  ;;  %v417_v30 = vmax.f32 %v353_v8, 0.0  ;;  %v419_v11 = vmax.f32 %v355_v24, 0.0  ;;  %v295_v8 = vmul.f32 %v739_v0, %v812_v34 }
  0x2c   : > { %474 = vst [vmem:[%s800_s26] sm:$0xff] %v1216_v21  ;;  %v356_v21 = vadd.f32 %v749_v6, %v288_v12  ;;  %v358_v27 = vadd.f32 %v749_v6, %v290_v9  ;;  %v421_v9 = vmax.f32 %v357_v26, 0.0 }
  0x2d   : > { %475 = vst [vmem:[%s800_s26 + $0x8] sm:$0xff] %v411_v13  ;;  %v293_v13 = vmul.f32 %v739_v0, %v806_v32  ;;  %v418_v15 = vmax.f32 %v354_v17, 0.0  ;;  %v360_v32 = vadd.f32 %v749_v6, %v292_v29  ;;  %v297_v17 = vmul.f32 %v739_v0, %v818_v36 }
  0x2e   : > { %476 = vst [vmem:[%s800_s26 + $0x10] sm:$0xff] %v412_v10  ;;  %v294_v10 = vmul.f32 %v739_v0, %v809_v33  ;;  %v420_v12 = vmax.f32 %v356_v21, 0.0  ;;  %v363_v35 = vadd.f32 %v749_v6, %v295_v8  ;;  %v364_v36 = vadd.f32 %v749_v6, %v296_v16 }
  0x2f   : > { %477 = vst [vmem:[%s800_s26 + $0x18] sm:$0xff] %v413_v19  ;;  %v361_v33 = vadd.f32 %v749_v6, %v293_v13  ;;  %v422_v19 = vmax.f32 %v358_v27, 0.0  ;;  %v424_v24 = vmax.f32 %v360_v32, 0.0  ;;  %v365_v37 = vadd.f32 %v749_v6, %v297_v17 }
  0x30   : > { %478 = vst [vmem:[%s800_s26 + $0x20] sm:$0xff] %v414_v22  ;;  %v362_v34 = vadd.f32 %v749_v6, %v294_v10  ;;  %v423_v22 = vmax.f32 %v359_v31, 0.0  ;;  %v301_v21 = vmul.f32 %v739_v0, %v830_v40  ;;  %v427_v26 = vmax.f32 %v363_v35, 0.0 }
  0x31   : > { %479 = vst [vmem:[%s800_s26 + $0x28] sm:$0xff] %v415_v23  ;;  %v299_v23 = vmul.f32 %v739_v0, %v824_v38  ;;  %v366_v38 = vadd.f32 %v749_v6, %v298_v20  ;;  %v303_v13 = vmul.f32 %v739_v0, %v836_v42  ;;  %v368_v40 = vadd.f32 %v749_v6, %v300_v25 }
  0x32   : > { %480 = vst [vmem:[%s800_s26 + $0x30] sm:$0xff] %v416_v14  ;;  %v425_v14 = vmax.f32 %v361_v33, 0.0  ;;  %v426_v29 = vmax.f32 %v362_v34, 0.0  ;;  %v304_v27 = vmul.f32 %v739_v0, %v839_v43  ;;  %v429_v10 = vmax.f32 %v365_v37, 0.0 }
  0x33   : > { %481 = vst [vmem:[%s800_s26 + $0x38] sm:$0xff] %v417_v30  ;;  %v302_v30 = vmul.f32 %v739_v0, %v833_v41  ;;  %v367_v39 = vadd.f32 %v749_v6, %v299_v23  ;;  %v369_v41 = vadd.f32 %v749_v6, %v301_v21  ;;  %v430_v31 = vmax.f32 %v366_v38, 0.0 }
  0x34   : > { %482 = vst [vmem:[%s800_s26 + $0x40] sm:$0xff] %v418_v15  ;;  %v428_v15 = vmax.f32 %v364_v36, 0.0  ;;  %v306_v8 = vmul.f32 %v739_v0, %v845_v45  ;;  %v371_v43 = vadd.f32 %v749_v6, %v303_v13  ;;  %v307_v32 = vmul.f32 %v739_v0, %v848_v46 }
  0x35   : > { %483 = vst [vmem:[%s800_s26 + $0x48] sm:$0xff] %v419_v11  ;;  %v305_v11 = vmul.f32 %v739_v0, %v842_v44  ;;  %v370_v42 = vadd.f32 %v749_v6, %v302_v30  ;;  %v432_v16 = vmax.f32 %v368_v40, 0.0  ;;  %v372_v44 = vadd.f32 %v749_v6, %v304_v27 }
  0x36   : > { %484 = vst [vmem:[%s800_s26 + $0x50] sm:$0xff] %v420_v12  ;;  %v431_v12 = vmax.f32 %v367_v39, 0.0  ;;  %v433_v33 = vmax.f32 %v369_v41, 0.0  ;;  %v309_v17 = vmul.f32 %v739_v0, %v854_v48  ;;  %v374_v46 = vadd.f32 %v749_v6, %v306_v8 }
  0x37   : > { %485 = vst [vmem:[%s800_s26 + $0x58] sm:$0xff] %v421_v9  ;;  %v308_v9 = vmul.f32 %v739_v0, %v851_v47  ;;  %v373_v45 = vadd.f32 %v749_v6, %v305_v11  ;;  %v310_v34 = vmul.f32 %v739_v0, %v857_v49  ;;  %v435_v20 = vmax.f32 %v371_v43, 0.0 }
  0x38   : > { %486 = vst [vmem:[%s800_s26 + $0x60] sm:$0xff] %v422_v19  ;;  %v434_v19 = vmax.f32 %v370_v42, 0.0  ;;  %v375_v47 = vadd.f32 %v749_v6, %v307_v32  ;;  %v436_v35 = vmax.f32 %v372_v44, 0.0  ;;  %v312_v23 = vmul.f32 %v739_v0, %v863_v51 }
  0x39   : > { %487 = vst [vmem:[%s800_s26 + $0x68] sm:$0xff] %v423_v22  ;;  %v311_v22 = vmul.f32 %v739_v0, %v860_v50  ;;  %v376_v48 = vadd.f32 %v749_v6, %v308_v9  ;;  %v377_v49 = vadd.f32 %v749_v6, %v309_v17  ;;  %v313_v36 = vmul.f32 %v739_v0, %v866_v52 }
  0x3a   : > { %488 = vst [vmem:[%s800_s26 + $0x70] sm:$0xff] %v424_v24  ;;  %v437_v24 = vmax.f32 %v373_v45, 0.0  ;;  %v438_v25 = vmax.f32 %v374_v46, 0.0  ;;  %v378_v50 = vadd.f32 %v749_v6, %v310_v34  ;;  %v341_v37 = vmul.f32 %v739_v0, %v956_v18 }
  0x3b   : > { %489 = vst [vmem:[%s800_s26 + $0x78] sm:$0xff] %v425_v14  ;;  %v314_v14 = vmul.f32 %v739_v0, %v869_v53  ;;  %v439_v51 = vmax.f32 %v375_v47, 0.0  ;;  %v379_v21 = vadd.f32 %v749_v6, %v311_v22  ;;  %v440_v52 = vmax.f32 %v376_v48, 0.0 }
  0x3c   : > { %490 = vst [vmem:[%s800_s26 + $0x80] sm:$0xff] %v426_v29  ;;  %v315_v29 = vmul.f32 %v739_v0, %v872_v54  ;;  %v380_v38 = vadd.f32 %v749_v6, %v312_v23  ;;  %v316_v30 = vmul.f32 %v739_v0, %v875_v55  ;;  %v1078_v53 = vadd.f32 %v749_v6, %v341_v37 }
  0x3d   : > { %491 = vst [vmem:[%s800_s26 + $0x88] sm:$0xff] %v427_v26  ;;  %v441_v18 = vmax.f32 %v377_v49, 0.0  ;;  %v381_v26 = vadd.f32 %v749_v6, %v313_v36  ;;  %v317_v39 = vmul.f32 %v739_v0, %v878_v56  ;;  %v442_v54 = vmax.f32 %v378_v50, 0.0 }
  0x3e   : > { %492 = vst [vmem:[%s800_s26 + $0x90] sm:$0xff] %v428_v15  ;;  %v382_v13 = vadd.f32 %v749_v6, %v314_v14  ;;  %v318_v15 = vmul.f32 %v739_v0, %v881_v57  ;;  %v443_v55 = vmax.f32 %v379_v21, 0.0  ;;  %v383_v40 = vadd.f32 %v749_v6, %v315_v29 }
  0x3f   : > { %493 = vst [vmem:[%s800_s26 + $0x98] sm:$0xff] %v429_v10  ;;  %v319_v27 = vmul.f32 %v739_v0, %v884_v58  ;;  %v444_v10 = vmax.f32 %v380_v38, 0.0  ;;  %v384_v56 = vadd.f32 %v749_v6, %v316_v30  ;;  %v320_v41 = vmul.f32 %v739_v0, %v887_v59  ;;  %v1221_v38 = vld [vmem:[#allocation6_spill] sm:$0xff] }
  0x40   : > { %494 = vst [vmem:[%s800_s26 + $0xa0] sm:$0xff] %v430_v31  ;;  %v445_v11 = vmax.f32 %v381_v26, 0.0  ;;  %v385_v57 = vadd.f32 %v749_v6, %v317_v39  ;;  %v321_v31 = vmul.f32 %v739_v0, %v890_v60  ;;  %v446_v42 = vmax.f32 %v382_v13, 0.0  ;;  %v1222_v39 = vld [vmem:[#allocation7_spill] sm:$0xff] }
  0x41   : > { %495 = vst [vmem:[%s800_s26 + $0xa8] sm:$0xff] %v431_v12  ;;  %v386_v58 = vadd.f32 %v749_v6, %v318_v15  ;;  %v322_v8 = vmul.f32 %v739_v0, %v893_v61  ;;  %v447_v12 = vmax.f32 %v383_v40, 0.0  ;;  %v387_v59 = vadd.f32 %v749_v6, %v319_v27 }
  0x42   : > { %496 = vst [vmem:[%s800_s26 + $0xb0] sm:$0xff] %v432_v16  ;;  %v323_v43 = vmul.f32 %v739_v0, %v896_v62  ;;  %v448_v32 = vmax.f32 %v384_v56, 0.0  ;;  %v388_v60 = vadd.f32 %v749_v6, %v320_v41  ;;  %v324_v16 = vmul.f32 %v739_v0, %v899_v63 }
  0x43   : > { %497 = vst [vmem:[%s800_s26 + $0xb8] sm:$0xff] %v433_v33  ;;  %v449_v44 = vmax.f32 %v385_v57, 0.0  ;;  %v389_v61 = vadd.f32 %v749_v6, %v321_v31  ;;  %v325_v9 = vmul.f32 %v739_v0, %v902_v1  ;;  %v450_v33 = vmax.f32 %v386_v58, 0.0 }
  0x44   : > { %498 = vst [vmem:[%s800_s26 + $0xc0] sm:$0xff] %v434_v19  ;;  %v390_v62 = vadd.f32 %v749_v6, %v322_v8  ;;  %v326_v45 = vmul.f32 %v739_v0, %v905_v2  ;;  %v451_v17 = vmax.f32 %v387_v59, 0.0  ;;  %v391_v63 = vadd.f32 %v749_v6, %v323_v43  ;;  %v1225_v59 = vld [vmem:[#allocation10_spill] sm:$0xff] }
  0x45   : > { %499 = vst [vmem:[%s800_s26 + $0xc8] sm:$0xff] %v435_v20  ;;  %v327_v19 = vmul.f32 %v739_v0, %v908_v3  ;;  %v452_v46 = vmax.f32 %v388_v60, 0.0  ;;  %v392_v1 = vadd.f32 %v749_v6, %v324_v16  ;;  %v328_v34 = vmul.f32 %v739_v0, %v911_v4 }
  0x46   : > { %500 = vst [vmem:[%s800_s26 + $0xd0] sm:$0xff] %v436_v35  ;;  %v453_v20 = vmax.f32 %v389_v61, 0.0  ;;  %v393_v2 = vadd.f32 %v749_v6, %v325_v9  ;;  %v329_v47 = vmul.f32 %v739_v0, %v914_v5  ;;  %v454_v22 = vmax.f32 %v390_v62, 0.0  ;;  %v1217_v35 = vld [vmem:[#allocation2_spill] sm:$0xff] }
  0x47   : > { %501 = vst [vmem:[%s800_s26 + $0xd8] sm:$0xff] %v437_v24  ;;  %v394_v3 = vadd.f32 %v749_v6, %v326_v45  ;;  %v330_v48 = vmul.f32 %v739_v0, %v1217_v35  ;;  %v455_v23 = vmax.f32 %v391_v63, 0.0  ;;  %v395_v4 = vadd.f32 %v749_v6, %v327_v19  ;;  %v1218_v24 = vld [vmem:[#allocation3_spill] sm:$0xff] }
  0x48   : > { %502 = vst [vmem:[%s800_s26 + $0xe0] sm:$0xff] %v438_v25  ;;  %v331_v49 = vmul.f32 %v739_v0, %v1218_v24  ;;  %v456_v36 = vmax.f32 %v392_v1, 0.0  ;;  %v396_v5 = vadd.f32 %v749_v6, %v328_v34  ;;  %v1219_v25 = vld [vmem:[#allocation4_spill] sm:$0xff]  ;;  %v457_v14 = vmax.f32 %v393_v2, 0.0 }
  0x49   : > { %503 = vst [vmem:[%s800_s26 + $0xe8] sm:$0xff] %v439_v51  ;;  %v332_v50 = vmul.f32 %v739_v0, %v1219_v25  ;;  %v397_v37 = vadd.f32 %v749_v6, %v329_v47  ;;  %v1220_v51 = vld [vmem:[#allocation5_spill] sm:$0xff]  ;;  %v458_v29 = vmax.f32 %v394_v3, 0.0  ;;  %v334_v30 = vmul.f32 %v739_v0, %v1221_v38 }
  0x4a   : > { %504 = vst [vmem:[%s800_s26 + $0xf0] sm:$0xff] %v440_v52  ;;  %v333_v21 = vmul.f32 %v739_v0, %v1220_v51  ;;  %v398_v52 = vadd.f32 %v749_v6, %v330_v48  ;;  %v399_v26 = vadd.f32 %v749_v6, %v331_v49  ;;  %v460_v13 = vmax.f32 %v396_v5, 0.0 }
  0x4b   : > { %505 = vst [vmem:[%s800_s26 + $0xf8] sm:$0xff] %v441_v18  ;;  %v459_v18 = vmax.f32 %v395_v4, 0.0  ;;  %v400_v15 = vadd.f32 %v749_v6, %v332_v50  ;;  %v461_v40 = vmax.f32 %v397_v37, 0.0  ;;  %v338_v57 = vmul.f32 %v739_v0, %v944_v7 }
  0x4c   : > { %506 = vst [vmem:[%s800_s26 + $0x100] sm:$0xff] %v442_v54  ;;  %v335_v54 = vmul.f32 %v739_v0, %v1222_v39  ;;  %v401_v27 = vadd.f32 %v749_v6, %v333_v21  ;;  %v462_v41 = vmax.f32 %v398_v52, 0.0  ;;  %v463_v31 = vmax.f32 %v399_v26, 0.0 }
  0x4d   : > { %507 = vst [vmem:[%s800_s26 + $0x108] sm:$0xff] %v443_v55  ;;  %v336_v55 = vmul.f32 %v739_v0, %v938_v28  ;;  %v464_v8 = vmax.f32 %v400_v15, 0.0  ;;  %v340_v43 = vmul.f32 %v739_v0, %v1225_v59  ;;  %v406_v16 = vadd.f32 %v749_v6, %v338_v57 }
  0x4e   : > { %508 = vst [vmem:[%s800_s26 + $0x110] sm:$0xff] %v444_v10  ;;  %v1223_v10 = vld [vmem:[#allocation8_spill] sm:$0xff]  ;;  %v403_v28 = vadd.f32 %v749_v6, %v335_v54  ;;  %v465_v7 = vmax.f32 %v401_v27, 0.0  ;;  %v473_v63 = vmax.f32 %v1078_v53, 0.0 }
  0x4f   : > { %509 = vst [vmem:[%s800_s26 + $0x118] sm:$0xff] %v445_v11  ;;  %v337_v56 = vmul.f32 %v739_v0, %v1223_v10  ;;  %v402_v11 = vadd.f32 %v749_v6, %v334_v30  ;;  %v408_v9 = vadd.f32 %v749_v6, %v340_v43  ;;  %v470_v62 = vmax.f32 %v406_v16, 0.0 }
  0x50   : > { %510 = vst [vmem:[%s800_s26 + $0x120] sm:$0xff] %v446_v42  ;;  %v1224_v42 = vld [vmem:[#allocation9_spill] sm:$0xff] }
  0x51   : > { %511 = vst [vmem:[%s800_s26 + $0x128] sm:$0xff] %v447_v12  ;;  %v339_v58 = vmul.f32 %v739_v0, %v1224_v42  ;;  %v404_v12 = vadd.f32 %v749_v6, %v336_v55  ;;  %v466_v60 = vmax.f32 %v402_v11, 0.0 }
  0x52   : > { %512 = vst [vmem:[%s800_s26 + $0x130] sm:$0xff] %v448_v32  ;;  %v405_v32 = vadd.f32 %v749_v6, %v337_v56 }
  0x53   : > { %513 = vst [vmem:[%s800_s26 + $0x138] sm:$0xff] %v449_v44  ;;  %v467_v44 = vmax.f32 %v403_v28, 0.0  ;;  %v407_v61 = vadd.f32 %v749_v6, %v339_v58  ;;  %v468_v0 = vmax.f32 %v404_v12, 0.0 }
  0x54   : > { %514 = vst [vmem:[%s800_s26 + $0x140] sm:$0xff] %v450_v33  ;;  %v469_v33 = vmax.f32 %v405_v32, 0.0 }
  0x55   : > { %515 = vst [vmem:[%s800_s26 + $0x148] sm:$0xff] %v451_v17  ;;  %v471_v45 = vmax.f32 %v407_v61, 0.0  ;;  %v472_v17 = vmax.f32 %v408_v9, 0.0 }
  0x56   : > { %516 = vst [vmem:[%s800_s26 + $0x150] sm:$0xff] %v452_v46 }
  0x57   : > { %517 = vst [vmem:[%s800_s26 + $0x158] sm:$0xff] %v453_v20 }
  0x58   : > { %518 = vst [vmem:[%s800_s26 + $0x160] sm:$0xff] %v454_v22 }
  0x59   : > { %519 = vst [vmem:[%s800_s26 + $0x168] sm:$0xff] %v455_v23 }
  0x5a   : > { %520 = vst [vmem:[%s800_s26 + $0x170] sm:$0xff] %v456_v36 }
  0x5b   : > { %521 = vst [vmem:[%s800_s26 + $0x178] sm:$0xff] %v457_v14 }
  0x5c   : > { %522 = vst [vmem:[%s800_s26 + $0x180] sm:$0xff] %v458_v29 }
  0x5d   : > { %523 = vst [vmem:[%s800_s26 + $0x188] sm:$0xff] %v459_v18 }
  0x5e   : > { %524 = vst [vmem:[%s800_s26 + $0x190] sm:$0xff] %v460_v13 }
  0x5f   : > { %525 = vst [vmem:[%s800_s26 + $0x198] sm:$0xff] %v461_v40 }
  0x60   : > { %526 = vst [vmem:[%s800_s26 + $0x1a0] sm:$0xff] %v462_v41 }
  0x61   : > { %527 = vst [vmem:[%s800_s26 + $0x1a8] sm:$0xff] %v463_v31 }
  0x62   : > { %528 = vst [vmem:[%s800_s26 + $0x1b0] sm:$0xff] %v464_v8 }
  0x63   : > { %529 = vst [vmem:[%s800_s26 + $0x1b8] sm:$0xff] %v465_v7 }
  0x64   : > { %530 = vst [vmem:[%s800_s26 + $0x1c0] sm:$0xff] %v466_v60 }
  0x65   : > { %531 = vst [vmem:[%s800_s26 + $0x1c8] sm:$0xff] %v467_v44 }
  0x66   : > { %532 = vst [vmem:[%s800_s26 + $0x1d0] sm:$0xff] %v468_v0 }
  0x67   : > { %533 = vst [vmem:[%s800_s26 + $0x1d8] sm:$0xff] %v469_v33 }
  0x68   : > { %534 = vst [vmem:[%s800_s26 + $0x1e0] sm:$0xff] %v470_v62 }
  0x69   : > { %535 = vst [vmem:[%s800_s26 + $0x1e8] sm:$0xff] %v471_v45 }
  0x6a   : > { %536 = vst [vmem:[%s800_s26 + $0x1f0] sm:$0xff] %v472_v17 }
  0x6b   : > { %537 = vst [vmem:[%s800_s26 + $0x1f8] sm:$0xff] %v473_v63 }
  0x6c PF: > { %s13_s14 = sadd.s32 1, %s686_s14   ;;  %s1226_s12 = smov %s682_s13 }
  0x6d   : > { %p10_p5 = scmp.ge.s32.totalorder %s13_s14, 4   ;;  %s1227_s13 = smov %s1229_s15 }
  0x6f   :  { %12 = sbr.rel (!%p10_p5) target bundleno = 2 (0x2), region = 62 }

// kernel: conv_down_forward.2
= control target key start
LH: loop header
LB: loop body
LE: loop exit
PB: predicated region body
PF: predicated region fallthrough
CT: control target
= control target key end

     0   :  { %s1494_s15 = smov 0   ;;  %s1496_s16 = smov 0   ;;  %s1955_s0 = inlined_call_operand.vmem [shape: bf16[2,512,128], index: 0, kind: input, shape index: {}]   ;;  %s1956_s1 = inlined_call_operand.vmem [shape: bf16[128,128], index: 1, kind: input, shape index: {}]   ;;  %s1957_s2 = inlined_call_operand.vmem [shape: f32[2,512,128], index: 2, kind: output, shape index: {0}]   ;;  %s1958_s3 = inlined_call_operand.vmem [shape: f32[2,1,128], index: 3, kind: output, shape index: {1}]   ;;  %s1959_s4 = inlined_call_operand.vmem [shape: f32[2,1,128], index: 4, kind: output, shape index: {2}]  }
   0x1   :  { %s1498_s17 = smov 0  }
   0x2 LB: > { %s27_s18 = sadd.s32 1, %s1463_s16  ;;  %p1188_p0 = scmp.ge.s32.totalorder %s1467_s17, 1  ;;  %s1467_s17 = sphi %s1498_s17, %s15_s17   ;;  %s1463_s16 = sphi %s1496_s16, %s1961_s16   ;;  %s1459_s15 = sphi %s1494_s15, %s1960_s15  }
   0x3   : > { %p29_p1 = scmp.ge.s32.totalorder %s27_s18, 2  ;;  %p192_p2 = scmp.lt.s32.totalorder %s1467_s17, 3 }
   0x5   : > { %s1963_s18 = smov (%p29_p1, %s27_s18), 0  ;;  %p193_p3 = pnand %p1188_p0, %p192_p2 }
   0x6   : > { %p239_p4 = scmp.lt.s32.totalorder (!%p193_p3), %s1459_s15, 1 }
   0x7   : > { %196 = sbr.rel (%p193_p3) target bundleno = 403 (0x193), region = 28 }
   0xc   : > { %v1396_v0 = vld [vmem:[%s1956_s1 + $0x38] sm:$0xff]  ;;  %v1395_v1 = vld [vmem:[%s1956_s1 + $0x30] sm:$0xff]  ;;  %v1394_v2 = vld [vmem:[%s1956_s1 + $0x28] sm:$0xff]  ;;  %s1965_s15 = smov (!%p239_p4, %s1459_s15), 1 }
   0xd   : > { %590 = vmatpush.bf16.msra.mxu0 %v1396_v0  ;;  %1397 = vmatpush.bf16.msra.mxu1 %v1396_v0  ;;  %v1393_v3 = vld [vmem:[%s1956_s1 + $0x20] sm:$0xff]  ;;  %v1392_v4 = vld [vmem:[%s1956_s1 + $0x18] sm:$0xff]  ;;  %v1391_v5 = vld [vmem:[%s1956_s1 + $0x10] sm:$0xff]  ;;  %s1355_s7 = sshll.u32 %s1965_s15, 8  ;;  %s1356_s13 = sshll.u32 %s1965_s15, 9 }
   0xe   : > { %1398 = vmatpush.bf16.msra.mxu2 %v1396_v0  ;;  %1399 = vmatpush.bf16.msra.mxu3 %v1396_v0  ;;  %v1390_v6 = vld [vmem:[%s1956_s1 + $0x8] sm:$0xff]  ;;  %v1389_v7 = vld [vmem:[%s1956_s1] sm:$0xff]  ;;  %s1546_s12 = scalar_lea.vmem %s1955_s0, %s1355_s7  ;;  %s1580_s20 = scalar_lea.vmem %s1957_s2, %s1356_s13 }
   0xf   : > { %v1357_v8 = vld [vmem:[%s1546_s12] sm:$0xff]  ;;  %v1358_v10 = vld [vmem:[%s1546_s12 + $0x8] sm:$0xff]  ;;  %v1359_v13 = vld [vmem:[%s1546_s12 + $0x10] sm:$0xff]  ;;  %s263_s23 = scalar_lea.vmem %s1958_s3, %s1965_s15  ;;  %s269_s26 = scalar_lea.vmem %s1959_s4, %s1965_s15 }
  0x10   : > { %v1365_v9 = vld [vmem:[%s1546_s12 + $0x40] sm:$0xff]  ;;  %v1366_v11 = vld [vmem:[%s1546_s12 + $0x48] sm:$0xff]  ;;  %v1367_v14 = vld [vmem:[%s1546_s12 + $0x50] sm:$0xff] }
  0x11   : > { %591 = vmatpush.bf16.msra.mxu0 %v1395_v1  ;;  %1400 = vmatpush.bf16.msra.mxu1 %v1395_v1  ;;  %v1373_v12 = vld [vmem:[%s1546_s12 + $0x80] sm:$0xff]  ;;  %v1374_v15 = vld [vmem:[%s1546_s12 + $0x88] sm:$0xff]  ;;  %v1360_v16 = vld [vmem:[%s1546_s12 + $0x18] sm:$0xff] }
  0x12   : > { %1401 = vmatpush.bf16.msra.mxu2 %v1395_v1  ;;  %1402 = vmatpush.bf16.msra.mxu3 %v1395_v1  ;;  %v1368_v17 = vld [vmem:[%s1546_s12 + $0x58] sm:$0xff]  ;;  %v1375_v18 = vld [vmem:[%s1546_s12 + $0x90] sm:$0xff]  ;;  %v1381_v19 = vld [vmem:[%s1546_s12 + $0xc0] sm:$0xff] }
  0x13   : > { %v1361_v20 = vld [vmem:[%s1546_s12 + $0x20] sm:$0xff]  ;;  %v1376_v22 = vld [vmem:[%s1546_s12 + $0x98] sm:$0xff]  ;;  %v1382_v23 = vld [vmem:[%s1546_s12 + $0xc8] sm:$0xff] }
  0x14   : > { %v1369_v21 = vld [vmem:[%s1546_s12 + $0x60] sm:$0xff]  ;;  %v1362_v24 = vld [vmem:[%s1546_s12 + $0x28] sm:$0xff]  ;;  %v1383_v27 = vld [vmem:[%s1546_s12 + $0xd0] sm:$0xff] }
  0x15   : > { %592 = vmatpush.bf16.msra.mxu0 %v1394_v2  ;;  %1403 = vmatpush.bf16.msra.mxu1 %v1394_v2  ;;  %v1370_v25 = vld [vmem:[%s1546_s12 + $0x68] sm:$0xff]  ;;  %v1377_v26 = vld [vmem:[%s1546_s12 + $0xa0] sm:$0xff]  ;;  %v1363_v28 = vld [vmem:[%s1546_s12 + $0x30] sm:$0xff] }
  0x16   : > { %1404 = vmatpush.bf16.msra.mxu2 %v1394_v2  ;;  %1405 = vmatpush.bf16.msra.mxu3 %v1394_v2  ;;  %v1371_v29 = vld [vmem:[%s1546_s12 + $0x70] sm:$0xff]  ;;  %v1378_v30 = vld [vmem:[%s1546_s12 + $0xa8] sm:$0xff]  ;;  %v1384_v31 = vld [vmem:[%s1546_s12 + $0xd8] sm:$0xff] }
  0x17   : > { %v1364_v32 = vld [vmem:[%s1546_s12 + $0x38] sm:$0xff]  ;;  %v1379_v34 = vld [vmem:[%s1546_s12 + $0xb0] sm:$0xff]  ;;  %v1385_v35 = vld [vmem:[%s1546_s12 + $0xe0] sm:$0xff] }
  0x18   : > { %v1372_v33 = vld [vmem:[%s1546_s12 + $0x78] sm:$0xff]  ;;  %v1386_v39 = vld [vmem:[%s1546_s12 + $0xe8] sm:$0xff]  ;;  %v1387_v51 = vld [vmem:[%s1546_s12 + $0xf0] sm:$0xff] }
  0x19   : > { %593 = vmatpush.bf16.msra.mxu0 %v1393_v3  ;;  %1406 = vmatpush.bf16.msra.mxu1 %v1393_v3  ;;  %v1380_v38 = vld [vmem:[%s1546_s12 + $0xb8] sm:$0xff] }
  0x1a   : > { %1407 = vmatpush.bf16.msra.mxu2 %v1393_v3  ;;  %1408 = vmatpush.bf16.msra.mxu3 %v1393_v3  ;;  %v1388_v0 = vld [vmem:[%s1546_s12 + $0xf8] sm:$0xff] }
  0x1d   : > { %594 = vmatpush.bf16.msra.mxu0 %v1392_v4  ;;  %1409 = vmatpush.bf16.msra.mxu1 %v1392_v4 }
  0x1e   : > { %1410 = vmatpush.bf16.msra.mxu2 %v1392_v4  ;;  %1411 = vmatpush.bf16.msra.mxu3 %v1392_v4 }
  0x21   : > { %595 = vmatpush.bf16.msra.mxu0 %v1391_v5  ;;  %1412 = vmatpush.bf16.msra.mxu1 %v1391_v5 }
  0x22   : > { %1413 = vmatpush.bf16.msra.mxu2 %v1391_v5  ;;  %1414 = vmatpush.bf16.msra.mxu3 %v1391_v5 }
  0x25   : > { %596 = vmatpush.bf16.msra.mxu0 %v1390_v6  ;;  %1415 = vmatpush.bf16.msra.mxu1 %v1390_v6 }
  0x26   : > { %1416 = vmatpush.bf16.msra.mxu2 %v1390_v6  ;;  %1417 = vmatpush.bf16.msra.mxu3 %v1390_v6 }
  0x29   : > { %597 = vmatpush.bf16.msra.mxu0 %v1389_v7  ;;  %1418 = vmatpush.bf16.msra.mxu1 %v1389_v7 }
  0x2a   : > { %1419 = vmatpush.bf16.msra.mxu2 %v1389_v7  ;;  %1420 = vmatpush.bf16.msra.mxu3 %v1389_v7 }
  0x2c   : > { %598 = vmatmul.bf16.vlgmr.msra.gmra.mxu0 %v1357_v8  ;;  %638 = vmatmul.bf16.vlgmr.msra.gmra.mxu1 %v1365_v9 }
  0x2d   : > { %678 = vmatmul.bf16.vlgmr.msra.gmra.mxu2 %v1373_v12  ;;  %718 = vmatmul.bf16.vlgmr.msra.gmra.mxu3 %v1381_v19 }
  0x3c   : > { %603 = vmatmul.bf16.gmra.mxu0 %v1358_v10  ;;  %643 = vmatmul.bf16.gmra.mxu1 %v1366_v11 }
  0x3d   : > { %683 = vmatmul.bf16.gmra.mxu2 %v1374_v15  ;;  %723 = vmatmul.bf16.gmra.mxu3 %v1382_v23 }
  0x4c   : > { %608 = vmatmul.bf16.gmra.mxu0 %v1359_v13  ;;  %648 = vmatmul.bf16.gmra.mxu1 %v1367_v14 }
  0x4d   : > { %688 = vmatmul.bf16.gmra.mxu2 %v1375_v18  ;;  %728 = vmatmul.bf16.gmra.mxu3 %v1383_v27 }
  0x5c   : > { %613 = vmatmul.bf16.gmra.mxu0 %v1360_v16  ;;  %653 = vmatmul.bf16.gmra.mxu1 %v1368_v17 }
  0x5d   : > { %693 = vmatmul.bf16.gmra.mxu2 %v1376_v22  ;;  %733 = vmatmul.bf16.gmra.mxu3 %v1384_v31 }
  0x6c   : > { %618 = vmatmul.bf16.gmra.mxu0 %v1361_v20  ;;  %658 = vmatmul.bf16.gmra.mxu1 %v1369_v21 }
  0x6d   : > { %698 = vmatmul.bf16.gmra.mxu2 %v1377_v26  ;;  %738 = vmatmul.bf16.gmra.mxu3 %v1385_v35 }
  0x7c   : > { %623 = vmatmul.bf16.gmra.mxu0 %v1362_v24  ;;  %663 = vmatmul.bf16.gmra.mxu1 %v1370_v25 }
  0x7d   : > { %703 = vmatmul.bf16.gmra.mxu2 %v1378_v30  ;;  %743 = vmatmul.bf16.gmra.mxu3 %v1386_v39 }
  0x8c   : > { %628 = vmatmul.bf16.gmra.mxu0 %v1363_v28  ;;  %668 = vmatmul.bf16.gmra.mxu1 %v1371_v29 }
  0x8d   : > { %708 = vmatmul.bf16.gmra.mxu2 %v1379_v34  ;;  %748 = vmatmul.bf16.gmra.mxu3 %v1387_v51 }
  0x9c   : > { %633 = vmatmul.bf16.gmra.mxu0 %v1364_v32  ;;  %673 = vmatmul.bf16.gmra.mxu1 %v1372_v33 }
  0x9d   : > { %713 = vmatmul.bf16.gmra.mxu2 %v1380_v38  ;;  %753 = vmatmul.bf16.gmra.mxu3 %v1388_v0 }
  0xa9   : > { %v599_v36 = vpop.f32.mrf.mxu0  ;;  %v1582_v37 = vpop.f32.mrf.mxu1 }
  0xaa   : > { %759 = vst [vmem:[%s1580_s20] sm:$0xff] %v599_v36  ;;  %v893_v42 = vmul.f32 %v599_v36, %v599_v36 }
  0xab   : > { %775 = vst [vmem:[%s1580_s20 + $0x80] sm:$0xff] %v1582_v37 }
  0xb0   : > { %v1603_v56 = vpop.f32.mrf.mxu2  ;;  %v1646_v10 = vpop.f32.mrf.mxu3 }
  0xb1   : > { %v601_v40 = vpop.f32.mrf.mxu0  ;;  %v1589_v41 = vpop.f32.mrf.mxu1  ;;  %791 = vst [vmem:[%s1580_s20 + $0x100] sm:$0xff] %v1603_v56 }
  0xb2   : > { %760 = vst [vmem:[%s1580_s20 + $0x8] sm:$0xff] %v601_v40  ;;  %v823_v43 = vadd.f32 %v601_v40, %v599_v36  ;;  %v894_v44 = vmul.f32 %v601_v40, %v601_v40 }
  0xb3   : > { %776 = vst [vmem:[%s1580_s20 + $0x88] sm:$0xff] %v1589_v41 }
  0xb4   : > { %v957_v45 = vadd.f32 %v894_v44, %v893_v42  ;;  %807 = vst [vmem:[%s1580_s20 + $0x180] sm:$0xff] %v1646_v10 }
  0xb8   : > { %v1614_v62 = vpop.f32.mrf.mxu2  ;;  %v1659_v14 = vpop.f32.mrf.mxu3 }
  0xb9   : > { %v604_v46 = vpop.f32.mrf.mxu0  ;;  %v1594_v47 = vpop.f32.mrf.mxu1  ;;  %792 = vst [vmem:[%s1580_s20 + $0x108] sm:$0xff] %v1614_v62 }
  0xba   : > { %761 = vst [vmem:[%s1580_s20 + $0x10] sm:$0xff] %v604_v46  ;;  %v824_v48 = vadd.f32 %v823_v43, %v604_v46  ;;  %v895_v49 = vmul.f32 %v604_v46, %v604_v46 }
  0xbb   : > { %777 = vst [vmem:[%s1580_s20 + $0x90] sm:$0xff] %v1594_v47 }
  0xbc   : > { %v958_v50 = vadd.f32 %v957_v45, %v895_v49  ;;  %808 = vst [vmem:[%s1580_s20 + $0x188] sm:$0xff] %v1659_v14 }
  0xc0   : > { %v1626_v3 = vpop.f32.mrf.mxu2  ;;  %v1672_v18 = vpop.f32.mrf.mxu3 }
  0xc1   : > { %v606_v52 = vpop.f32.mrf.mxu0  ;;  %v1600_v53 = vpop.f32.mrf.mxu1  ;;  %793 = vst [vmem:[%s1580_s20 + $0x110] sm:$0xff] %v1626_v3 }
  0xc2   : > { %762 = vst [vmem:[%s1580_s20 + $0x18] sm:$0xff] %v606_v52  ;;  %v825_v54 = vadd.f32 %v824_v48, %v606_v52  ;;  %v896_v55 = vmul.f32 %v606_v52, %v606_v52 }
  0xc3   : > { %778 = vst [vmem:[%s1580_s20 + $0x98] sm:$0xff] %v1600_v53 }
  0xc4   : > { %v959_v57 = vadd.f32 %v958_v50, %v896_v55  ;;  %809 = vst [vmem:[%s1580_s20 + $0x190] sm:$0xff] %v1672_v18 }
  0xc8   : > { %v1635_v6 = vpop.f32.mrf.mxu2  ;;  %v1685_v22 = vpop.f32.mrf.mxu3 }
  0xc9   : > { %v609_v58 = vpop.f32.mrf.mxu0  ;;  %v1609_v59 = vpop.f32.mrf.mxu1  ;;  %794 = vst [vmem:[%s1580_s20 + $0x118] sm:$0xff] %v1635_v6 }
  0xca   : > { %763 = vst [vmem:[%s1580_s20 + $0x20] sm:$0xff] %v609_v58  ;;  %v1612_v60 = vadd.f32 %v825_v54, %v609_v58  ;;  %v897_v61 = vmul.f32 %v609_v58, %v609_v58 }
  0xcb   : > { %779 = vst [vmem:[%s1580_s20 + $0xa0] sm:$0xff] %v1609_v59 }
  0xcc   : > { %v1618_v63 = vadd.f32 %v959_v57, %v897_v61  ;;  %810 = vst [vmem:[%s1580_s20 + $0x198] sm:$0xff] %v1685_v22 }
  0xd0   : > { %v1644_v9 = vpop.f32.mrf.mxu2  ;;  %v1698_v26 = vpop.f32.mrf.mxu3 }
  0xd1   : > { %v611_v1 = vpop.f32.mrf.mxu0  ;;  %v1623_v2 = vpop.f32.mrf.mxu1  ;;  %795 = vst [vmem:[%s1580_s20 + $0x120] sm:$0xff] %v1644_v9 }
  0xd2   : > { %764 = vst [vmem:[%s1580_s20 + $0x28] sm:$0xff] %v611_v1  ;;  %v898_v31 = vmul.f32 %v611_v1, %v611_v1  ;;  %v827_v32 = vadd.f32 %v1612_v60, %v611_v1 }
  0xd3   : > { %780 = vst [vmem:[%s1580_s20 + $0xa8] sm:$0xff] %v1623_v2 }
  0xd4   : > { %811 = vst [vmem:[%s1580_s20 + $0x1a0] sm:$0xff] %v1698_v26  ;;  %v961_v34 = vadd.f32 %v1618_v63, %v898_v31 }
  0xd8   : > { %v1657_v13 = vpop.f32.mrf.mxu2  ;;  %v1711_v30 = vpop.f32.mrf.mxu3 }
  0xd9   : > { %v614_v4 = vpop.f32.mrf.mxu0  ;;  %v1632_v5 = vpop.f32.mrf.mxu1  ;;  %796 = vst [vmem:[%s1580_s20 + $0x128] sm:$0xff] %v1657_v13 }
  0xda   : > { %765 = vst [vmem:[%s1580_s20 + $0x30] sm:$0xff] %v614_v4  ;;  %v899_v33 = vmul.f32 %v614_v4, %v614_v4  ;;  %v828_v35 = vadd.f32 %v827_v32, %v614_v4 }
  0xdb   : > { %781 = vst [vmem:[%s1580_s20 + $0xb0] sm:$0xff] %v1632_v5 }
  0xdc   : > { %812 = vst [vmem:[%s1580_s20 + $0x1a8] sm:$0xff] %v1711_v30  ;;  %v962_v40 = vadd.f32 %v961_v34, %v899_v33 }
  0xe0   : > { %v1670_v17 = vpop.f32.mrf.mxu2  ;;  %v1726_v45 = vpop.f32.mrf.mxu3 }
  0xe1   : > { %v616_v7 = vpop.f32.mrf.mxu0  ;;  %v1641_v8 = vpop.f32.mrf.mxu1  ;;  %797 = vst [vmem:[%s1580_s20 + $0x130] sm:$0xff] %v1670_v17 }
  0xe2   : > { %766 = vst [vmem:[%s1580_s20 + $0x38] sm:$0xff] %v616_v7  ;;  %v900_v36 = vmul.f32 %v616_v7, %v616_v7  ;;  %v829_v42 = vadd.f32 %v828_v35, %v616_v7 }
  0xe3   : > { %782 = vst [vmem:[%s1580_s20 + $0xb8] sm:$0xff] %v1641_v8 }
  0xe4   : > { %v963_v46 = vadd.f32 %v962_v40, %v900_v36  ;;  %813 = vst [vmem:[%s1580_s20 + $0x1b0] sm:$0xff] %v1726_v45 }
  0xe8   : > { %v1683_v21 = vpop.f32.mrf.mxu2  ;;  %v1739_v4 = vpop.f32.mrf.mxu3 }
  0xe9   : > { %v619_v11 = vpop.f32.mrf.mxu0  ;;  %v1654_v12 = vpop.f32.mrf.mxu1  ;;  %798 = vst [vmem:[%s1580_s20 + $0x138] sm:$0xff] %v1683_v21 }
  0xea   : > { %767 = vst [vmem:[%s1580_s20 + $0x40] sm:$0xff] %v619_v11  ;;  %v901_v43 = vmul.f32 %v619_v11, %v619_v11  ;;  %v830_v48 = vadd.f32 %v829_v42, %v619_v11 }
  0xeb   : > { %783 = vst [vmem:[%s1580_s20 + $0xc0] sm:$0xff] %v1654_v12 }
  0xec   : > { %v964_v50 = vadd.f32 %v963_v46, %v901_v43  ;;  %814 = vst [vmem:[%s1580_s20 + $0x1b8] sm:$0xff] %v1739_v4 }
  0xf0   : > { %v1696_v25 = vpop.f32.mrf.mxu2  ;;  %v1752_v43 = vpop.f32.mrf.mxu3 }
  0xf1   : > { %v621_v15 = vpop.f32.mrf.mxu0  ;;  %v1667_v16 = vpop.f32.mrf.mxu1  ;;  %799 = vst [vmem:[%s1580_s20 + $0x140] sm:$0xff] %v1696_v25 }
  0xf2   : > { %768 = vst [vmem:[%s1580_s20 + $0x48] sm:$0xff] %v621_v15  ;;  %v902_v49 = vmul.f32 %v621_v15, %v621_v15  ;;  %v831_v51 = vadd.f32 %v830_v48, %v621_v15 }
  0xf3   : > { %784 = vst [vmem:[%s1580_s20 + $0xc8] sm:$0xff] %v1667_v16 }
  0xf4   : > { %v965_v54 = vadd.f32 %v964_v50, %v902_v49  ;;  %815 = vst [vmem:[%s1580_s20 + $0x1c0] sm:$0xff] %v1752_v43  ;;  %v910_v49 = vmul.f32 %v1589_v41, %v1589_v41 }
  0xf8   : > { %v1709_v29 = vpop.f32.mrf.mxu2 }
  0xf9   : > { %v624_v19 = vpop.f32.mrf.mxu0  ;;  %v1680_v20 = vpop.f32.mrf.mxu1  ;;  %800 = vst [vmem:[%s1580_s20 + $0x148] sm:$0xff] %v1709_v29 }
  0xfa   : > { %769 = vst [vmem:[%s1580_s20 + $0x50] sm:$0xff] %v624_v19  ;;  %v903_v52 = vmul.f32 %v624_v19, %v624_v19  ;;  %v832_v55 = vadd.f32 %v831_v51, %v624_v19 }
  0xfb   : > { %785 = vst [vmem:[%s1580_s20 + $0xd0] sm:$0xff] %v1680_v20 }
  0xfc   : > { %v966_v61 = vadd.f32 %v965_v54, %v903_v52  ;;  %v911_v52 = vmul.f32 %v1594_v47, %v1594_v47 }
 0x100   : > { %v1724_v44 = vpop.f32.mrf.mxu2 }
 0x101   : > { %v626_v23 = vpop.f32.mrf.mxu0  ;;  %v1693_v24 = vpop.f32.mrf.mxu1  ;;  %801 = vst [vmem:[%s1580_s20 + $0x150] sm:$0xff] %v1724_v44 }
 0x102   : > { %770 = vst [vmem:[%s1580_s20 + $0x58] sm:$0xff] %v626_v23  ;;  %v904_v57 = vmul.f32 %v626_v23, %v626_v23  ;;  %v833_v63 = vadd.f32 %v832_v55, %v626_v23 }
 0x103   : > { %786 = vst [vmem:[%s1580_s20 + $0xd8] sm:$0xff] %v1693_v24 }
 0x104   : > { %v967_v7 = vadd.f32 %v966_v61, %v904_v57 }
 0x108   : > { %v1737_v1 = vpop.f32.mrf.mxu2 }
 0x109   : > { %v629_v27 = vpop.f32.mrf.mxu0  ;;  %v1706_v28 = vpop.f32.mrf.mxu1  ;;  %802 = vst [vmem:[%s1580_s20 + $0x158] sm:$0xff] %v1737_v1 }
 0x10a   : > { %771 = vst [vmem:[%s1580_s20 + $0x60] sm:$0xff] %v629_v27  ;;  %v905_v0 = vmul.f32 %v629_v27, %v629_v27  ;;  %v834_v11 = vadd.f32 %v833_v63, %v629_v27  ;;  %v1774_v63 = vpop.f32.mrf.mxu3 }
 0x10b   : > { %787 = vst [vmem:[%s1580_s20 + $0xe0] sm:$0xff] %v1706_v28 }
 0x10c   : > { %v968_v19 = vadd.f32 %v967_v7, %v905_v0  ;;  %816 = vst [vmem:[%s1580_s20 + $0x1c8] sm:$0xff] %v1774_v63 }
 0x110   : > { %v1750_v42 = vpop.f32.mrf.mxu2 }
 0x111   : > { %v631_v38 = vpop.f32.mrf.mxu0  ;;  %v1721_v39 = vpop.f32.mrf.mxu1  ;;  %803 = vst [vmem:[%s1580_s20 + $0x160] sm:$0xff] %v1750_v42 }
 0x112   : > { %772 = vst [vmem:[%s1580_s20 + $0x68] sm:$0xff] %v631_v38  ;;  %v906_v15 = vmul.f32 %v631_v38, %v631_v38  ;;  %v835_v31 = vadd.f32 %v834_v11, %v631_v38  ;;  %v909_v38 = vmul.f32 %v1582_v37, %v1582_v37 }
 0x113   : > { %788 = vst [vmem:[%s1580_s20 + $0xe8] sm:$0xff] %v1721_v39 }
 0x114   : > { %v969_v32 = vadd.f32 %v968_v19, %v906_v15  ;;  %v915_v15 = vmul.f32 %v1632_v5, %v1632_v5 }
 0x118   : > { %v1772_v61 = vpop.f32.mrf.mxu2 }
 0x119   : > { %v634_v58 = vpop.f32.mrf.mxu0  ;;  %v1734_v60 = vpop.f32.mrf.mxu1  ;;  %804 = vst [vmem:[%s1580_s20 + $0x168] sm:$0xff] %v1772_v61 }
 0x11a   : > { %773 = vst [vmem:[%s1580_s20 + $0x70] sm:$0xff] %v634_v58  ;;  %v907_v23 = vmul.f32 %v634_v58, %v634_v58  ;;  %v836_v33 = vadd.f32 %v835_v31, %v634_v58 }
 0x11b   : > { %789 = vst [vmem:[%s1580_s20 + $0xf0] sm:$0xff] %v1734_v60 }
 0x11c   : > { %v970_v36 = vadd.f32 %v969_v32, %v907_v23  ;;  %v916_v23 = vmul.f32 %v1641_v8, %v1641_v8 }
 0x121   : > { %v636_v34 = vpop.f32.mrf.mxu0  ;;  %v1747_v35 = vpop.f32.mrf.mxu1 }
 0x122   : > { %774 = vst [vmem:[%s1580_s20 + $0x78] sm:$0xff] %v636_v34  ;;  %v837_v40 = vadd.f32 %v836_v33, %v636_v34  ;;  %v908_v27 = vmul.f32 %v636_v34, %v636_v34  ;;  %v1792_v33 = vpop.f32.mrf.mxu2  ;;  %v1794_v34 = vpop.f32.mrf.mxu3 }
 0x123   : > { %790 = vst [vmem:[%s1580_s20 + $0xf8] sm:$0xff] %v1747_v35 }
 0x124   : > { %v838_v46 = vadd.f32 %v837_v40, %v1582_v37  ;;  %v971_v48 = vadd.f32 %v970_v36, %v908_v27  ;;  %v912_v37 = vmul.f32 %v1600_v53, %v1600_v53  ;;  %805 = vst [vmem:[%s1580_s20 + $0x170] sm:$0xff] %v1792_v33 }
 0x125   : > { %817 = vst [vmem:[%s1580_s20 + $0x1d0] sm:$0xff] %v1794_v34 }
 0x126   : > { %v839_v50 = vadd.f32 %v838_v46, %v1589_v41  ;;  %v972_v51 = vadd.f32 %v971_v48, %v909_v38  ;;  %v913_v41 = vmul.f32 %v1609_v59, %v1609_v59  ;;  %v919_v38 = vmul.f32 %v1680_v20, %v1680_v20 }
 0x128   : > { %v840_v54 = vadd.f32 %v839_v50, %v1594_v47  ;;  %v973_v55 = vadd.f32 %v972_v51, %v910_v49  ;;  %v920_v49 = vmul.f32 %v1693_v24, %v1693_v24 }
 0x12a   : > { %v841_v57 = vadd.f32 %v840_v54, %v1600_v53  ;;  %v974_v58 = vadd.f32 %v973_v55, %v911_v52  ;;  %v914_v53 = vmul.f32 %v1623_v2, %v1623_v2  ;;  %v1812_v51 = vpop.f32.mrf.mxu2  ;;  %v1814_v52 = vpop.f32.mrf.mxu3  ;;  %v921_v54 = vmul.f32 %v1706_v28, %v1706_v28 }
 0x12b   : > { %806 = vst [vmem:[%s1580_s20 + $0x178] sm:$0xff] %v1812_v51 }
 0x12c   : > { %v842_v0 = vadd.f32 %v841_v57, %v1609_v59  ;;  %v975_v47 = vadd.f32 %v974_v58, %v912_v37  ;;  %818 = vst [vmem:[%s1580_s20 + $0x1d8] sm:$0xff] %v1814_v52 }
 0x12e   : > { %v843_v7 = vadd.f32 %v842_v0, %v1623_v2  ;;  %v976_v11 = vadd.f32 %v975_v47, %v913_v41  ;;  %v917_v2 = vmul.f32 %v1654_v12, %v1654_v12  ;;  %v923_v41 = vmul.f32 %v1734_v60, %v1734_v60 }
 0x130   : > { %v977_v19 = vadd.f32 %v976_v11, %v914_v53  ;;  %v844_v31 = vadd.f32 %v843_v7, %v1632_v5  ;;  %v918_v5 = vmul.f32 %v1667_v16, %v1667_v16 }
 0x132   : > { %v845_v59 = vadd.f32 %v844_v31, %v1641_v8  ;;  %v978_v32 = vadd.f32 %v977_v19, %v915_v15  ;;  %v1832_v53 = vpop.f32.mrf.mxu3 }
 0x133   : > { %819 = vst [vmem:[%s1580_s20 + $0x1e0] sm:$0xff] %v1832_v53 }
 0x134   : > { %v846_v36 = vadd.f32 %v845_v59, %v1654_v12  ;;  %v979_v40 = vadd.f32 %v978_v32, %v916_v23  ;;  %v928_v59 = vmul.f32 %v1635_v6, %v1635_v6 }
 0x136   : > { %v847_v8 = vadd.f32 %v846_v36, %v1667_v16  ;;  %v980_v27 = vadd.f32 %v979_v40, %v917_v2 }
 0x138   : > { %v848_v46 = vadd.f32 %v847_v8, %v1680_v20  ;;  %v981_v48 = vadd.f32 %v980_v27, %v918_v5 }
 0x13a   : > { %v849_v12 = vadd.f32 %v848_v46, %v1693_v24  ;;  %v982_v50 = vadd.f32 %v981_v48, %v919_v38  ;;  %v922_v24 = vmul.f32 %v1721_v39, %v1721_v39  ;;  %v932_v46 = vmul.f32 %v1683_v21, %v1683_v21 }
 0x13c   : > { %v850_v16 = vadd.f32 %v849_v12, %v1706_v28  ;;  %v983_v20 = vadd.f32 %v982_v50, %v920_v49  ;;  %v924_v28 = vmul.f32 %v1747_v35, %v1747_v35 }
 0x13e   : > { %v984_v55 = vadd.f32 %v983_v20, %v921_v54  ;;  %v851_v37 = vadd.f32 %v850_v16, %v1721_v39  ;;  %v925_v39 = vmul.f32 %v1603_v56, %v1603_v56 }
 0x140   : > { %v985_v57 = vadd.f32 %v984_v55, %v922_v24  ;;  %v852_v58 = vadd.f32 %v851_v37, %v1734_v60  ;;  %v926_v60 = vmul.f32 %v1614_v62, %v1614_v62  ;;  %v936_v24 = vmul.f32 %v1737_v1, %v1737_v1 }
 0x142   : > { %v986_v0 = vadd.f32 %v985_v57, %v923_v41  ;;  %v853_v47 = vadd.f32 %v852_v58, %v1747_v35  ;;  %v927_v35 = vmul.f32 %v1626_v3, %v1626_v3 }
 0x144   : > { %v854_v7 = vadd.f32 %v853_v47, %v1603_v56  ;;  %v987_v11 = vadd.f32 %v986_v0, %v924_v28  ;;  %v1848_v56 = vpop.f32.mrf.mxu3 }
 0x145   : > { %820 = vst [vmem:[%s1580_s20 + $0x1e8] sm:$0xff] %v1848_v56 }
 0x146   : > { %v855_v15 = vadd.f32 %v854_v7, %v1614_v62  ;;  %v988_v19 = vadd.f32 %v987_v11, %v925_v39  ;;  %v929_v62 = vmul.f32 %v1644_v9, %v1644_v9 }
 0x148   : > { %v856_v31 = vadd.f32 %v855_v15, %v1626_v3  ;;  %v989_v23 = vadd.f32 %v988_v19, %v926_v60  ;;  %v930_v3 = vmul.f32 %v1657_v13, %v1657_v13  ;;  %v940_v60 = vmul.f32 %v1812_v51, %v1812_v51 }
 0x14a   : > { %v857_v32 = vadd.f32 %v856_v31, %v1635_v6  ;;  %v990_v2 = vadd.f32 %v989_v23, %v927_v35  ;;  %v931_v6 = vmul.f32 %v1670_v17, %v1670_v17 }
 0x14c   : > { %v858_v36 = vadd.f32 %v857_v32, %v1644_v9  ;;  %v991_v40 = vadd.f32 %v990_v2, %v928_v59  ;;  %v1864_v9 = vpop.f32.mrf.mxu3 }
 0x14d   : > { %821 = vst [vmem:[%s1580_s20 + $0x1f0] sm:$0xff] %v1864_v9 }
 0x14e   : > { %v859_v5 = vadd.f32 %v858_v36, %v1657_v13  ;;  %v992_v8 = vadd.f32 %v991_v40, %v929_v62  ;;  %v933_v13 = vmul.f32 %v1696_v25, %v1696_v25 }
 0x150   : > { %v993_v27 = vadd.f32 %v992_v8, %v930_v3  ;;  %v860_v38 = vadd.f32 %v859_v5, %v1670_v17  ;;  %v934_v17 = vmul.f32 %v1709_v29, %v1709_v29 }
 0x152   : > { %v861_v48 = vadd.f32 %v860_v38, %v1683_v21  ;;  %v994_v49 = vadd.f32 %v993_v27, %v931_v6  ;;  %v935_v21 = vmul.f32 %v1724_v44, %v1724_v44 }
 0x154   : > { %v862_v12 = vadd.f32 %v861_v48, %v1696_v25  ;;  %v995_v50 = vadd.f32 %v994_v49, %v932_v46  ;;  %v756_v25 = vpop.f32.mrf.mxu3 }
 0x155   : > { %822 = vst [vmem:[%s1580_s20 + $0x1f8] sm:$0xff] %v756_v25 }
 0x156   : > { %v863_v16 = vadd.f32 %v862_v12, %v1709_v29  ;;  %v996_v54 = vadd.f32 %v995_v50, %v933_v13  ;;  %v937_v29 = vmul.f32 %v1750_v42, %v1750_v42  ;;  %v952_v50 = vmul.f32 %v1814_v52, %v1814_v52 }
 0x158   : > { %v864_v20 = vadd.f32 %v863_v16, %v1724_v44  ;;  %v997_v55 = vadd.f32 %v996_v54, %v934_v17  ;;  %v938_v44 = vmul.f32 %v1772_v61, %v1772_v61  ;;  %v953_v54 = vmul.f32 %v1832_v53, %v1832_v53 }
 0x15a   : > { %v865_v37 = vadd.f32 %v864_v20, %v1737_v1  ;;  %v998_v57 = vadd.f32 %v997_v55, %v935_v21  ;;  %v939_v1 = vmul.f32 %v1792_v33, %v1792_v33  ;;  %v954_v20 = vmul.f32 %v1848_v56, %v1848_v56 }
 0x15c   : > { %v999_v58 = vadd.f32 %v998_v57, %v936_v24  ;;  %v866_v41 = vadd.f32 %v865_v37, %v1750_v42  ;;  %v941_v42 = vmul.f32 %v1646_v10, %v1646_v10  ;;  %v956_v57 = vmul.f32 %v756_v25, %v756_v25 }
 0x15e   : > { %v1000_v0 = vadd.f32 %v999_v58, %v937_v29  ;;  %v867_v47 = vadd.f32 %v866_v41, %v1772_v61  ;;  %v942_v61 = vmul.f32 %v1659_v14, %v1659_v14 }
 0x160   : > { %v1001_v28 = vadd.f32 %v1000_v0, %v938_v44  ;;  %v868_v39 = vadd.f32 %v867_v47, %v1792_v33  ;;  %v943_v33 = vmul.f32 %v1672_v18, %v1672_v18 }
 0x162   : > { %v1002_v7 = vadd.f32 %v1001_v28, %v939_v1  ;;  %v869_v11 = vadd.f32 %v868_v39, %v1812_v51  ;;  %v944_v51 = vmul.f32 %v1685_v22, %v1685_v22 }
 0x164   : > { %v870_v15 = vadd.f32 %v869_v11, %v1646_v10  ;;  %v1003_v19 = vadd.f32 %v1002_v7, %v940_v60  ;;  %v945_v10 = vmul.f32 %v1698_v26, %v1698_v26 }
 0x166   : > { %v871_v35 = vadd.f32 %v870_v15, %v1659_v14  ;;  %v1004_v31 = vadd.f32 %v1003_v19, %v941_v42  ;;  %v946_v14 = vmul.f32 %v1711_v30, %v1711_v30 }
 0x168   : > { %v872_v23 = vadd.f32 %v871_v35, %v1672_v18  ;;  %v1005_v59 = vadd.f32 %v1004_v31, %v942_v61  ;;  %v947_v18 = vmul.f32 %v1726_v45, %v1726_v45 }
 0x16a   : > { %v873_v32 = vadd.f32 %v872_v23, %v1685_v22  ;;  %v1006_v2 = vadd.f32 %v1005_v59, %v943_v33  ;;  %v948_v22 = vmul.f32 %v1739_v4, %v1739_v4 }
 0x16c   : > { %v874_v62 = vadd.f32 %v873_v32, %v1698_v26  ;;  %v1007_v36 = vadd.f32 %v1006_v2, %v944_v51  ;;  %v949_v26 = vmul.f32 %v1752_v43, %v1752_v43 }
 0x16e   : > { %v875_v40 = vadd.f32 %v874_v62, %v1711_v30  ;;  %v1008_v3 = vadd.f32 %v1007_v36, %v945_v10  ;;  %v950_v30 = vmul.f32 %v1774_v63, %v1774_v63 }
 0x170   : > { %v1009_v5 = vadd.f32 %v1008_v3, %v946_v14  ;;  %v876_v8 = vadd.f32 %v875_v40, %v1726_v45  ;;  %v951_v45 = vmul.f32 %v1794_v34, %v1794_v34 }
 0x172   : > { %v877_v6 = vadd.f32 %v876_v8, %v1739_v4  ;;  %v1010_v27 = vadd.f32 %v1009_v5, %v947_v18 }
 0x174   : > { %v878_v38 = vadd.f32 %v877_v6, %v1752_v43  ;;  %v1011_v46 = vadd.f32 %v1010_v27, %v948_v22 }
 0x176   : > { %v879_v48 = vadd.f32 %v878_v38, %v1774_v63  ;;  %v1012_v49 = vadd.f32 %v1011_v46, %v949_v26 }
 0x178   : > { %v880_v13 = vadd.f32 %v879_v48, %v1794_v34  ;;  %v1013_v12 = vadd.f32 %v1012_v49, %v950_v30 }
 0x17a   : > { %v881_v4 = vadd.f32 %v880_v13, %v1814_v52  ;;  %v1014_v17 = vadd.f32 %v1013_v12, %v951_v45  ;;  %v955_v52 = vmul.f32 %v1864_v9, %v1864_v9 }
 0x17c   : > { %v1015_v43 = vadd.f32 %v1014_v17, %v952_v50  ;;  %v882_v16 = vadd.f32 %v881_v4, %v1832_v53 }
 0x17e   : > { %v1016_v63 = vadd.f32 %v1015_v43, %v953_v54  ;;  %v883_v21 = vadd.f32 %v882_v16, %v1848_v56 }
 0x180   : > { %v1017_v34 = vadd.f32 %v1016_v63, %v954_v20  ;;  %v884_v55 = vadd.f32 %v883_v21, %v1864_v9 }
 0x182   : > { %v1018_v37 = vadd.f32 %v1017_v34, %v955_v52  ;;  %v885_v24 = vadd.f32 %v884_v55, %v756_v25 }
 0x184   : > { %v886_v58 = vrot.slane %v885_v24, 4  ;;  %v1019_v41 = vadd.f32 %v1018_v37, %v956_v57 }
 0x186   : > { %v887_v53 = vadd.f32 %v886_v58, %v885_v24  ;;  %v1020_v29 = vrot.slane %v1019_v41, 4 }
 0x188   : > { %v888_v0 = vrot.slane %v887_v53, 2  ;;  %v1021_v47 = vadd.f32 %v1020_v29, %v1019_v41 }
 0x18a   : > { %v889_v44 = vadd.f32 %v888_v0, %v887_v53  ;;  %v1022_v28 = vrot.slane %v1021_v47, 2 }
 0x18c   : > { %v890_v56 = vrot.slane %v889_v44, 1  ;;  %v1023_v39 = vadd.f32 %v1022_v28, %v1021_v47 }
 0x18e   : > { %v891_v1 = vadd.f32 %v890_v56, %v889_v44  ;;  %v1024_v9 = vrot.slane %v1023_v39, 1 }
 0x190   : > { %892 = vst [vmem:[%s263_s23] sm:$0x1] %v891_v1  ;;  %v1025_v25 = vadd.f32 %v1024_v9, %v1023_v39 }
 0x192   : > { %1026 = vst [vmem:[%s269_s26] sm:$0x1] %v1025_v25 }
 0x193 PF: > { %s15_s17 = sadd.s32 1, %s1467_s17   ;;  %s1960_s15 = smov %s1463_s16 }
 0x194   : > { %p12_p5 = scmp.ge.s32.totalorder %s15_s17, 4   ;;  %s1961_s16 = smov %s1963_s18 }
 0x196   :  { %14 = sbr.rel (!%p12_p5) target bundleno = 2 (0x2), region = 82 }

</bundles_post_ra>
